<compile_context>
chip_gen: v5e
topology: v5e:2x2
jax: 0.10.0
libtpu: 0.0.40
codegen_flags: <defaults>
</compile_context>

<pallas_src>
import functools

import jax
import jax.numpy as jnp
from jax.experimental import pallas as pl
from jax.experimental.pallas import tpu as pltpu

H_DIM1 = 256
H_DIM2 = 128
K_PAD = 128  # state+action features zero-padded to one full lane tile


def _critic_kernel(x_ref, w1_ref, b1_ref, w2_ref, b2_ref, w3_ref, b3_ref, o_ref):
    """One batch tile of fc3(relu(fc2(relu(fc1(x)))))."""
    cdt = w1_ref.dtype                       # compute dtype (fp32 or bf16)
    x = x_ref[...]                           # (TM, K_PAD)

    # fc1 + ReLU (MXU, fp32 accumulation; biases kept fp32)
    h1 = jnp.dot(x, w1_ref[...], preferred_element_type=jnp.float32) + b1_ref[...]
    h1 = jnp.maximum(h1, 0.0).astype(cdt)    # (TM, H_DIM1)

    # fc2 + ReLU
    h2 = jnp.dot(h1, w2_ref[...], preferred_element_type=jnp.float32) + b2_ref[...]
    h2 = jnp.maximum(h2, 0.0)                # (TM, H_DIM2), fp32

    # fc3 has N=1: VPU multiply + cross-lane (XLU) reduction instead of an
    # MXU matmul that would use a single column of the systolic array.
    w3_row = w3_ref[...].astype(jnp.float32)                          # (1, H_DIM2)
    v = jnp.sum(h2 * w3_row, axis=-1, keepdims=True) + b3_ref[...]    # (TM, 1)
    o_ref[...] = v.astype(o_ref.dtype)


@functools.partial(jax.jit, static_argnames=("block_m",))
def critic_forward(state, action, kernel_params, *, block_m=128):
    """state: (B, S) or (S,); action: (B, A) or (A,) -> (B, 1) fp32 values.

    block_m=128 suits v5e; 256 is slightly better on v6e/v7x (kwarg).
    """
    if state.ndim == 1:        # mirror torch's unsqueeze(0)
        state = state[None, :]
    if action.ndim == 1:
        action = action[None, :]

    w1, b1, w2, b2, w3, b3 = kernel_params
    cdt = w1.dtype

    x = jnp.concatenate([state, action], axis=-1).astype(cdt)
    b, d_in = x.shape
    bp = pl.cdiv(b, block_m) * block_m
    # one-time glue: pad batch to a tile multiple and features to K_PAD
    x = jnp.pad(x, ((0, bp - b), (0, K_PAD - d_in)))
    num_tiles = bp // block_m

    flops = 2 * bp * (K_PAD * H_DIM1 + H_DIM1 * H_DIM2 + H_DIM2)
    bytes_accessed = (
        x.size * x.dtype.itemsize
        + sum(p.size * p.dtype.itemsize for p in kernel_params)
        + bp * 4
    )
    cost = pl.CostEstimate(flops=flops, transcendentals=0,
                           bytes_accessed=bytes_accessed)

    # Constant block index -> operand stays resident in VMEM across the grid.
    resident = lambda arr: pl.BlockSpec(arr.shape, lambda i: (0, 0))

    out = pl.pallas_call(
        _critic_kernel,
        out_shape=jax.ShapeDtypeStruct((bp, 1), jnp.float32),
        grid=(num_tiles,),
        in_specs=[
            pl.BlockSpec((block_m, K_PAD), lambda i: (i, 0)),   # x tiles over batch
            resident(w1), resident(b1),
            resident(w2), resident(b2),
            resident(w3), resident(b3),
        ],
        out_specs=pl.BlockSpec((block_m, 1), lambda i: (i, 0)),
        compiler_params=pltpu.CompilerParams(
            dimension_semantics=("parallel",),   # both TCs split the batch on v7x
        ),
        cost_estimate=cost,
    )(x, w1, b1, w2, b2, w3, b3)
    return out[:b]


def init_params(key, state_size, action_size, h_dim1=H_DIM1, h_dim2=H_DIM2):
    """PyTorch-Linear-style init; weights stored transposed as (in, out)."""
    d_in = state_size + action_size
    ks = jax.random.split(key, 6)

    def linear(kw, kb, fan_in, fan_out):
        bound = 1.0 / jnp.sqrt(jnp.float32(fan_in))
        w = jax.random.uniform(kw, (fan_in, fan_out), jnp.float32, -bound, bound)
        b = jax.random.uniform(kb, (fan_out,), jnp.float32, -bound, bound)
        return w, b

    w1, b1 = linear(ks[0], ks[1], d_in, h_dim1)
    w2, b2 = linear(ks[2], ks[3], h_dim1, h_dim2)
    w3, b3 = linear(ks[4], ks[5], h_dim2, 1)
    return (w1, b1, w2, b2, w3, b3)


def prepare_params(params, compute_dtype=jnp.float32):
    """One-time host-side transform into kernel layout.

    * w1's input dim is zero-padded to K_PAD (so x @ w1 sees an aligned K).
    * Weights cast to `compute_dtype` (bf16 recommended on v6e/v7x).
    * Biases stay fp32 (they add into the fp32 accumulator); w3 becomes a
      (1, H_DIM2) row for the VPU/XLU reduction, b3 a (1, 1) scalar block.
    """
    w1, b1, w2, b2, w3, b3 = params
    d_in = w1.shape[0]
    w1p = jnp.pad(w1, ((0, K_PAD - d_in), (0, 0))).astype(compute_dtype)
    return (
        w1p,
        b1.reshape(1, -1).astype(jnp.float32),
        w2.astype(compute_dtype),
        b2.reshape(1, -1).astype(jnp.float32),
        w3.reshape(1, -1).astype(compute_dtype),
        jnp.reshape(b3, (1, 1)).astype(jnp.float32),
    )


def critic_reference(state, action, params):
    """Plain-JAX reference (high-precision dots)."""
    if state.ndim == 1:
        state = state[None, :]
    if action.ndim == 1:
        action = action[None, :]
    w1, b1, w2, b2, w3, b3 = params
    hp = jax.lax.Precision.HIGHEST
    x = jnp.concatenate([state, action], axis=-1).astype(jnp.float32)
    h1 = jnp.maximum(jnp.dot(x, w1, precision=hp) + b1, 0.0)
    h2 = jnp.maximum(jnp.dot(h1, w2, precision=hp) + b2, 0.0)
    return jnp.dot(h2, w3, precision=hp) + b3


if __name__ == "__main__":
    state_size, action_size = 16, 4
    key = jax.random.PRNGKey(0)
    k_params, k_s1, k_a1, k_s2, k_a2 = jax.random.split(key, 5)

    params = init_params(k_params, state_size, action_size)
    kparams_f32 = prepare_params(params, jnp.float32)

    # --- single (state, action) pair (mirrors torch's unsqueeze(0) path) ---
    state = jax.random.normal(k_s1, (state_size,), jnp.float32)
    action = jax.random.normal(k_a1, (action_size,), jnp.float32)
    value = critic_forward(state, action, kparams_f32)
    jax.block_until_ready(value)
    ref1 = critic_reference(state, action, params)
    assert value.shape == (1, 1)
    assert jnp.allclose(value, ref1, atol=1e-4, rtol=1e-4)

    # --- batched evaluation: multi-step grid with resident weights (fp32) ---
    batch = 260  # -> 3 grid steps at block_m=128 (pads to 384 rows)
    states = jax.random.normal(k_s2, (batch, state_size), jnp.float32)
    actions = jax.random.normal(k_a2, (batch, action_size), jnp.float32)
    values = critic_forward(states, actions, kparams_f32)
    jax.block_until_ready(values)
    refs = critic_reference(states, actions, params)
    assert values.shape == (batch, 1)
    assert jnp.allclose(values, refs, atol=1e-4, rtol=1e-4)

    # --- same batch with bf16 operands (recommended on v6e/v7x MXU) ---
    kparams_bf16 = prepare_params(params, jnp.bfloat16)
    values_bf16 = critic_forward(states, actions, kparams_bf16)
    jax.block_until_ready(values_bf16)
    assert jnp.allclose(values_bf16, refs, atol=5e-2, rtol=5e-2)

    # TODO(synk): torch.from_numpy(...)/.to(device) host glue has no Pallas
    # equivalent; inputs are assumed to already be JAX arrays.
    print("KERNEL_OK")
</pallas_src>

<mosaic_0001>
module attributes {stable_mosaic.version = 11 : i64} {
  func.func @_critic_kernel(%arg0: i32, %arg1: memref<128x128xf32, #tpu.memory_space<vmem>>, %arg2: memref<128x256xf32, #tpu.memory_space<vmem>>, %arg3: memref<1x256xf32, #tpu.memory_space<vmem>>, %arg4: memref<256x128xf32, #tpu.memory_space<vmem>>, %arg5: memref<1x128xf32, #tpu.memory_space<vmem>>, %arg6: memref<1x128xf32, #tpu.memory_space<vmem>>, %arg7: memref<1x1xf32, #tpu.memory_space<vmem>>, %arg8: memref<128x1xf32, #tpu.memory_space<vmem>>) attributes {dimension_semantics = [#tpu.dimension_semantics<parallel>], iteration_bounds = array<i64: 1>, scalar_prefetch = 0 : i64, scratch_operands = 0 : i64, tpu.core_type = #tpu.core_type<tc>, window_params = [{transform_indices = @transform_0, window_bounds = array<i64: 128, 128>}, {pipeline_mode = #tpu.pipeline_mode<synchronous>, transform_indices = @transform_1, window_bounds = array<i64: 128, 256>}, {pipeline_mode = #tpu.pipeline_mode<synchronous>, transform_indices = @transform_2, window_bounds = array<i64: 1, 256>}, {pipeline_mode = #tpu.pipeline_mode<synchronous>, transform_indices = @transform_3, window_bounds = array<i64: 256, 128>}, {pipeline_mode = #tpu.pipeline_mode<synchronous>, transform_indices = @transform_4, window_bounds = array<i64: 1, 128>}, {pipeline_mode = #tpu.pipeline_mode<synchronous>, transform_indices = @transform_5, window_bounds = array<i64: 1, 128>}, {pipeline_mode = #tpu.pipeline_mode<synchronous>, transform_indices = @transform_6, window_bounds = array<i64: 1, 1>}, {transform_indices = @transform_7, window_bounds = array<i64: 128, 1>}]} {
    %c0 = arith.constant 0 : index
    %c0_0 = arith.constant 0 : index
    %0 = vector.load %arg1[%c0, %c0_0] : memref<128x128xf32, #tpu.memory_space<vmem>>, vector<128x128xf32>
    %c0_1 = arith.constant 0 : index
    %c0_2 = arith.constant 0 : index
    %1 = vector.load %arg2[%c0_1, %c0_2] : memref<128x256xf32, #tpu.memory_space<vmem>>, vector<128x256xf32>
    %cst = arith.constant dense<0.000000e+00> : vector<128x256xf32>
    %2 = tpu.matmul %0, %1, %cst {dimension_numbers = #tpu.dot_dimension_numbers<[1], [0], [0], [1], [0, 0, 1, 1], [], []>} : vector<128x128xf32>, vector<128x256xf32>, vector<128x256xf32> -> vector<128x256xf32>
    %c0_3 = arith.constant 0 : index
    %c0_4 = arith.constant 0 : index
    %3 = vector.load %arg3[%c0_3, %c0_4] : memref<1x256xf32, #tpu.memory_space<vmem>>, vector<1x256xf32>
    %4 = vector.broadcast %3 : vector<1x256xf32> to vector<128x256xf32>
    %5 = arith.addf %2, %4 : vector<128x256xf32>
    %cst_5 = arith.constant 0.000000e+00 : f32
    %6 = vector.broadcast %cst_5 : f32 to vector<128x256xf32>
    %7 = arith.maximumf %5, %6 : vector<128x256xf32>
    %c0_6 = arith.constant 0 : index
    %c0_7 = arith.constant 0 : index
    %8 = vector.load %arg4[%c0_6, %c0_7] : memref<256x128xf32, #tpu.memory_space<vmem>>, vector<256x128xf32>
    %cst_8 = arith.constant dense<0.000000e+00> : vector<128x128xf32>
    %9 = tpu.matmul %7, %8, %cst_8 {dimension_numbers = #tpu.dot_dimension_numbers<[1], [0], [0], [1], [0, 0, 1, 1], [], []>} : vector<128x256xf32>, vector<256x128xf32>, vector<128x128xf32> -> vector<128x128xf32>
    %c0_9 = arith.constant 0 : index
    %c0_10 = arith.constant 0 : index
    %10 = vector.load %arg5[%c0_9, %c0_10] : memref<1x128xf32, #tpu.memory_space<vmem>>, vector<1x128xf32>
    %11 = vector.broadcast %10 : vector<1x128xf32> to vector<128x128xf32>
    %12 = arith.addf %9, %11 : vector<128x128xf32>
    %cst_11 = arith.constant 0.000000e+00 : f32
    %13 = vector.broadcast %cst_11 : f32 to vector<128x128xf32>
    %14 = arith.maximumf %12, %13 : vector<128x128xf32>
    %c0_12 = arith.constant 0 : index
    %c0_13 = arith.constant 0 : index
    %15 = vector.load %arg6[%c0_12, %c0_13] : memref<1x128xf32, #tpu.memory_space<vmem>>, vector<1x128xf32>
    %16 = vector.broadcast %15 : vector<1x128xf32> to vector<128x128xf32>
    %17 = arith.mulf %14, %16 : vector<128x128xf32>
    %cst_14 = arith.constant dense<0.000000e+00> : vector<128xf32>
    %18 = vector.multi_reduction <add>, %17, %cst_14 [1] : vector<128x128xf32> to vector<128xf32>
    %19 = vector.shape_cast %18 : vector<128xf32> to vector<128x1xf32>
    %c0_15 = arith.constant 0 : index
    %c0_16 = arith.constant 0 : index
    %20 = vector.load %arg7[%c0_15, %c0_16] : memref<1x1xf32, #tpu.memory_space<vmem>>, vector<1x1xf32>
    %21 = vector.broadcast %20 : vector<1x1xf32> to vector<128x1xf32>
    %22 = arith.addf %19, %21 : vector<128x1xf32>
    %c0_17 = arith.constant 0 : index
    %c0_18 = arith.constant 0 : index
    %23 = vector.load %arg8[%c0_17, %c0_18] : memref<128x1xf32, #tpu.memory_space<vmem>>, vector<128x1xf32>
    tpu.vector_store %arg8[%c0_17, %c0_18], %22 {strides = array<i32>} : memref<128x1xf32, #tpu.memory_space<vmem>>, vector<128x1xf32>,
    return
  }
  func.func @transform_0(%arg0: i32) -> (i32, i32) {
    %c0_i32 = arith.constant 0 : i32
    %c0_i32_0 = arith.constant 0 : i32
    return %arg0, %c0_i32 : i32, i32
  }
  func.func @transform_1(%arg0: i32) -> (i32, i32) {
    %c0_i32 = arith.constant 0 : i32
    %c0_i32_0 = arith.constant 0 : i32
    %c0_i32_1 = arith.constant 0 : i32
    return %c0_i32, %c0_i32_0 : i32, i32
  }
  func.func @transform_2(%arg0: i32) -> (i32, i32) {
    %c0_i32 = arith.constant 0 : i32
    %c0_i32_0 = arith.constant 0 : i32
    %c0_i32_1 = arith.constant 0 : i32
    return %c0_i32, %c0_i32_0 : i32, i32
  }
  func.func @transform_3(%arg0: i32) -> (i32, i32) {
    %c0_i32 = arith.constant 0 : i32
    %c0_i32_0 = arith.constant 0 : i32
    %c0_i32_1 = arith.constant 0 : i32
    return %c0_i32, %c0_i32_0 : i32, i32
  }
  func.func @transform_4(%arg0: i32) -> (i32, i32) {
    %c0_i32 = arith.constant 0 : i32
    %c0_i32_0 = arith.constant 0 : i32
    %c0_i32_1 = arith.constant 0 : i32
    return %c0_i32, %c0_i32_0 : i32, i32
  }
  func.func @transform_5(%arg0: i32) -> (i32, i32) {
    %c0_i32 = arith.constant 0 : i32
    %c0_i32_0 = arith.constant 0 : i32
    %c0_i32_1 = arith.constant 0 : i32
    return %c0_i32, %c0_i32_0 : i32, i32
  }
  func.func @transform_6(%arg0: i32) -> (i32, i32) {
    %c0_i32 = arith.constant 0 : i32
    %c0_i32_0 = arith.constant 0 : i32
    %c0_i32_1 = arith.constant 0 : i32
    return %c0_i32, %c0_i32_0 : i32, i32
  }
  func.func @transform_7(%arg0: i32) -> (i32, i32) {
    %c0_i32 = arith.constant 0 : i32
    %c0_i32_0 = arith.constant 0 : i32
    return %arg0, %c0_i32 : i32, i32
  }
}

</mosaic_0001>

<bundles_post_ra>
// kernel: critic_forward.1
= control target key start
LH: loop header
LB: loop body
LE: loop exit
PB: predicated region body
PF: predicated region fallthrough
CT: control target
= control target key end

     0   :  { %s862_s0 = inlined_call_operand.vmem [shape: f32[128,128], index: 0, kind: input, shape index: {}]   ;;  %s863_s1 = inlined_call_operand.hbm [shape: f32[128,256], index: 1, kind: input, shape index: {}]   ;;  %s864_s2 = inlined_call_operand.vmem [shape: f32[1,256], index: 2, kind: input, shape index: {}]   ;;  %s865_s3 = inlined_call_operand.hbm [shape: f32[256,128], index: 3, kind: input, shape index: {}]   ;;  %s866_s4 = inlined_call_operand.vmem [shape: f32[1,128], index: 4, kind: input, shape index: {}]   ;;  %s867_s5 = inlined_call_operand.vmem [shape: f32[1,128], index: 5, kind: input, shape index: {}]   ;;  %s868_s6 = inlined_call_operand.<no memory space> [shape: f32[1,1], index: 6, kind: input, shape index: {}]   ;;  %s869_s7 = inlined_call_operand.vmem [shape: f32[128,1], index: 7, kind: output, shape index: {}]  }
   0x1   :  { %v12_v0 = vstv %s868_s6 }
   0x2   :  { %13 = vst [vmem:[#allocation2] sm:$0x1] %v12_v0 }
   0x3   :  { %14 = vsyncpa [#allocation4], 0  ;;  %s22_s28 = sshll.u32 %s863_s1, 4  ;;  %s23_s28 = int_to_ptr.hbm [resolvable:$true] %s22_s28 }
   0x4   :  { %15 = vsyncpa [#allocation6], 0  ;;  %s614_s29 = smov [#allocation3]   ;;  %s37_s10 = sshll.u32 %s865_s3, 4  ;;  %s38_s10 = int_to_ptr.hbm [resolvable:$true] %s37_s10 }
   0x5   :  { %s24_s30 = sshll.u32 %s614_s29, 4  ;;  %s615_s11 = smov 256   ;;  %s25_s30 = int_to_ptr.vmem [resolvable:$true] %s24_s30 }
   0x6   :  { %s616_s12 = smov 16   ;;  %s617_s6 = smov [#allocation5]  }
   0x7   :  { %30 = dma.hbm_to_vmem [thread:$0]  %s23_s28, 4096, %s25_s30, [#allocation4], %s615_s11, %s615_s11, %s616_s12  }
   0x8   :  { %s39_s13 = sshll.u32 %s617_s6, 4  ;;  %s618_s14 = smov 128   ;;  %s40_s13 = int_to_ptr.vmem [resolvable:$true] %s39_s13 }
   0x9   :  { %s619_s15 = smov 8  }
   0xa   :  { %45 = dma.hbm_to_vmem [thread:$0]  %s38_s10, 4096, %s40_s13, [#allocation6], %s618_s14, %s618_s14, %s619_s15  }
   0xb   :  { %610 = dma.done.wait [#allocation4], 4096  }
   0xc   :  { %611 = vsyncadd [#allocation4], 4294963200 }
   0xd   :  { %612 = dma.done.wait [#allocation6], 4096  }
   0xe   :  { %613 = vsyncadd [#allocation6], 4294963200  ;;  %v106_v1 = vld [vmem:[#allocation3 + $0xf0] sm:$0xff]  ;;  %v104_v2 = vld [vmem:[#allocation3 + $0xe0] sm:$0xff]  ;;  %vm530_vm0 = vcmask 7168  }
   0xf   :  { %v107_v3 = vld [vmem:[#allocation3 + $0xf8] sm:$0xff]  ;;  %114 = vmatpush.msra.mxu0 %v106_v1  ;;  %v105_v4 = vld [vmem:[#allocation3 + $0xe8] sm:$0xff]  ;;  %v102_v5 = vld [vmem:[#allocation3 + $0xd0] sm:$0xff] }
  0x10   :  { %179 = vmatpush.msra.mxu1 %v107_v3  ;;  %v103_v6 = vld [vmem:[#allocation3 + $0xd8] sm:$0xff]  ;;  %v100_v7 = vld [vmem:[#allocation3 + $0xc0] sm:$0xff]  ;;  %v101_v8 = vld [vmem:[#allocation3 + $0xc8] sm:$0xff] }
  0x11   :  { %115 = vmatpush.msra.mxu0 %v104_v2  ;;  %v98_v9 = vld [vmem:[#allocation3 + $0xb0] sm:$0xff]  ;;  %v99_v10 = vld [vmem:[#allocation3 + $0xb8] sm:$0xff]  ;;  %v96_v11 = vld [vmem:[#allocation3 + $0xa0] sm:$0xff] }
  0x12   :  { %180 = vmatpush.msra.mxu1 %v105_v4  ;;  %v97_v12 = vld [vmem:[#allocation3 + $0xa8] sm:$0xff]  ;;  %v94_v13 = vld [vmem:[#allocation3 + $0x90] sm:$0xff]  ;;  %v95_v14 = vld [vmem:[#allocation3 + $0x98] sm:$0xff] }
  0x13   :  { %116 = vmatpush.msra.mxu0 %v102_v5  ;;  %v92_v15 = vld [vmem:[#allocation3 + $0x80] sm:$0xff]  ;;  %v93_v16 = vld [vmem:[#allocation3 + $0x88] sm:$0xff]  ;;  %v90_v17 = vld [vmem:[#allocation3 + $0x70] sm:$0xff] }
  0x14   :  { %181 = vmatpush.msra.mxu1 %v103_v6  ;;  %v91_v18 = vld [vmem:[#allocation3 + $0x78] sm:$0xff]  ;;  %v88_v19 = vld [vmem:[#allocation3 + $0x60] sm:$0xff]  ;;  %v89_v20 = vld [vmem:[#allocation3 + $0x68] sm:$0xff] }
  0x15   :  { %117 = vmatpush.msra.mxu0 %v100_v7  ;;  %v86_v21 = vld [vmem:[#allocation3 + $0x50] sm:$0xff]  ;;  %v87_v22 = vld [vmem:[#allocation3 + $0x58] sm:$0xff]  ;;  %v84_v23 = vld [vmem:[#allocation3 + $0x40] sm:$0xff] }
  0x16   :  { %182 = vmatpush.msra.mxu1 %v101_v8  ;;  %v85_v24 = vld [vmem:[#allocation3 + $0x48] sm:$0xff]  ;;  %v82_v25 = vld [vmem:[#allocation3 + $0x30] sm:$0xff]  ;;  %v83_v26 = vld [vmem:[#allocation3 + $0x38] sm:$0xff] }
  0x17   :  { %118 = vmatpush.msra.mxu0 %v98_v9  ;;  %v80_v27 = vld [vmem:[#allocation3 + $0x20] sm:$0xff]  ;;  %v81_v28 = vld [vmem:[#allocation3 + $0x28] sm:$0xff]  ;;  %v78_v29 = vld [vmem:[#allocation3 + $0x10] sm:$0xff] }
  0x18   :  { %183 = vmatpush.msra.mxu1 %v99_v10  ;;  %v79_v30 = vld [vmem:[#allocation3 + $0x18] sm:$0xff]  ;;  %v76_v31 = vld [vmem:[#allocation3] sm:$0xff]  ;;  %v77_v32 = vld [vmem:[#allocation3 + $0x8] sm:$0xff] }
  0x19   :  { %119 = vmatpush.msra.mxu0 %v96_v11  ;;  %v60_v33 = vld [vmem:[%s862_s0] sm:$0xff]  ;;  %v61_v34 = vld [vmem:[%s862_s0 + $0x8] sm:$0xff]  ;;  %v62_v35 = vld [vmem:[%s862_s0 + $0x10] sm:$0xff] }
  0x1a   :  { %184 = vmatpush.msra.mxu1 %v97_v12  ;;  %v63_v36 = vld [vmem:[%s862_s0 + $0x18] sm:$0xff]  ;;  %v64_v37 = vld [vmem:[%s862_s0 + $0x20] sm:$0xff]  ;;  %v65_v38 = vld [vmem:[%s862_s0 + $0x28] sm:$0xff] }
  0x1b   :  { %120 = vmatpush.msra.mxu0 %v94_v13  ;;  %v66_v39 = vld [vmem:[%s862_s0 + $0x30] sm:$0xff]  ;;  %v67_v40 = vld [vmem:[%s862_s0 + $0x38] sm:$0xff]  ;;  %v68_v41 = vld [vmem:[%s862_s0 + $0x40] sm:$0xff] }
  0x1c   :  { %185 = vmatpush.msra.mxu1 %v95_v14  ;;  %v291_v42 = vld [vmem:[#allocation5 + $0x78] sm:$0xff]  ;;  %v290_v43 = vld [vmem:[#allocation5 + $0x70] sm:$0xff]  ;;  %v289_v46 = vld [vmem:[#allocation5 + $0x68] sm:$0xff] }
  0x1d   :  { %121 = vmatpush.msra.mxu0 %v92_v15  ;;  %v307_v44 = vld [vmem:[#allocation5 + $0xf8] sm:$0xff]  ;;  %312 = vmatpush.msra.mxu2 %v291_v42  ;;  %v306_v45 = vld [vmem:[#allocation5 + $0xf0] sm:$0xff]  ;;  %v69_v47 = vld [vmem:[%s862_s0 + $0x48] sm:$0xff] }
  0x1e   :  { %186 = vmatpush.msra.mxu1 %v93_v16  ;;  %377 = vmatpush.msra.mxu3 %v307_v44  ;;  %v288_v48 = vld [vmem:[#allocation5 + $0x60] sm:$0xff]  ;;  %v305_v49 = vld [vmem:[#allocation5 + $0xe8] sm:$0xff]  ;;  %v287_v50 = vld [vmem:[#allocation5 + $0x58] sm:$0xff] }
  0x1f   :  { %122 = vmatpush.msra.mxu0 %v90_v17  ;;  %313 = vmatpush.msra.mxu2 %v290_v43  ;;  %v304_v51 = vld [vmem:[#allocation5 + $0xe0] sm:$0xff]  ;;  %v286_v52 = vld [vmem:[#allocation5 + $0x50] sm:$0xff]  ;;  %v303_v53 = vld [vmem:[#allocation5 + $0xd8] sm:$0xff] }
  0x20   :  { %187 = vmatpush.msra.mxu1 %v91_v18  ;;  %378 = vmatpush.msra.mxu3 %v306_v45  ;;  %v285_v54 = vld [vmem:[#allocation5 + $0x48] sm:$0xff]  ;;  %v302_v55 = vld [vmem:[#allocation5 + $0xd0] sm:$0xff]  ;;  %v284_v57 = vld [vmem:[#allocation5 + $0x40] sm:$0xff] }
  0x21   :  { %123 = vmatpush.msra.mxu0 %v88_v19  ;;  %314 = vmatpush.msra.mxu2 %v289_v46  ;;  %v70_v56 = vld [vmem:[%s862_s0 + $0x50] sm:$0xff]  ;;  %v283_v59 = vld [vmem:[#allocation5 + $0x38] sm:$0xff]  ;;  %v300_v60 = vld [vmem:[#allocation5 + $0xc0] sm:$0xff] }
  0x22   :  { %188 = vmatpush.msra.mxu1 %v89_v20  ;;  %379 = vmatpush.msra.mxu3 %v305_v49  ;;  %v301_v58 = vld [vmem:[#allocation5 + $0xc8] sm:$0xff]  ;;  %v282_v61 = vld [vmem:[#allocation5 + $0x30] sm:$0xff]  ;;  %v299_v62 = vld [vmem:[#allocation5 + $0xb8] sm:$0xff] }
  0x23   :  { %124 = vmatpush.msra.mxu0 %v86_v21  ;;  %315 = vmatpush.msra.mxu2 %v288_v48  ;;  %v281_v63 = vld [vmem:[#allocation5 + $0x28] sm:$0xff]  ;;  %v298_v0 = vld [vmem:[#allocation5 + $0xb0] sm:$0xff]  ;;  %v280_v2 = vld [vmem:[#allocation5 + $0x20] sm:$0xff] }
  0x24   :  { %189 = vmatpush.msra.mxu1 %v87_v22  ;;  %380 = vmatpush.msra.mxu3 %v304_v51  ;;  %v71_v1 = vld [vmem:[%s862_s0 + $0x58] sm:$0xff]  ;;  %v297_v3 = vld [vmem:[#allocation5 + $0xa8] sm:$0xff]  ;;  %v296_v5 = vld [vmem:[#allocation5 + $0xa0] sm:$0xff] }
  0x25   :  { %125 = vmatpush.msra.mxu0 %v84_v23  ;;  %316 = vmatpush.msra.mxu2 %v287_v50  ;;  %v279_v4 = vld [vmem:[#allocation5 + $0x18] sm:$0xff]  ;;  %v278_v6 = vld [vmem:[#allocation5 + $0x10] sm:$0xff]  ;;  %v277_v9 = vld [vmem:[#allocation5 + $0x8] sm:$0xff] }
  0x26   :  { %190 = vmatpush.msra.mxu1 %v85_v24  ;;  %381 = vmatpush.msra.mxu3 %v303_v53  ;;  %v295_v7 = vld [vmem:[#allocation5 + $0x98] sm:$0xff]  ;;  %v294_v10 = vld [vmem:[#allocation5 + $0x90] sm:$0xff]  ;;  %v276_v11 = vld [vmem:[#allocation5] sm:$0xff] }
  0x27   :  { %126 = vmatpush.msra.mxu0 %v82_v25  ;;  %317 = vmatpush.msra.mxu2 %v286_v52  ;;  %v72_v8 = vld [vmem:[%s862_s0 + $0x60] sm:$0xff]  ;;  %v293_v12 = vld [vmem:[#allocation5 + $0x88] sm:$0xff]  ;;  %v75_v16 = vld [vmem:[%s862_s0 + $0x78] sm:$0xff] }
  0x28   :  { %191 = vmatpush.msra.mxu1 %v83_v26  ;;  %382 = vmatpush.msra.mxu3 %v302_v55  ;;  %v292_v13 = vld [vmem:[#allocation5 + $0x80] sm:$0xff]  ;;  %v74_v15 = vld [vmem:[%s862_s0 + $0x70] sm:$0xff] }
  0x29   :  { %127 = vmatpush.msra.mxu0 %v80_v27  ;;  %318 = vmatpush.msra.mxu2 %v285_v54  ;;  %v73_v14 = vld [vmem:[%s862_s0 + $0x68] sm:$0xff]  ;;  %v108_v17 = vld [vmem:[%s864_s2] sm:$0x3] }
  0x2a   :  { %192 = vmatpush.msra.mxu1 %v81_v28  ;;  %383 = vmatpush.msra.mxu3 %v301_v58  ;;  %v720_v18 = vperm.slane %v108_v17, 0  ;;  %v722_v19 = vperm.slane %v108_v17, 1 }
  0x2b   :  { %128 = vmatpush.msra.mxu0 %v78_v29  ;;  %319 = vmatpush.msra.mxu2 %v284_v57 }
  0x2c   :  { %193 = vmatpush.msra.mxu1 %v79_v30  ;;  %384 = vmatpush.msra.mxu3 %v300_v60 }
  0x2d   :  { %129 = vmatpush.msra.mxu0 %v76_v31  ;;  %320 = vmatpush.msra.mxu2 %v283_v59 }
  0x2e   :  { %194 = vmatpush.msra.mxu1 %v77_v32  ;;  %130 = vmatmul.f32.vlgmr.msra.gmra.mxu0 %v60_v33 }
  0x2f   :  { %195 = vmatmul.f32.vlgmr.msra.gmra.mxu1 %v60_v33  ;;  %321 = vmatpush.msra.mxu2 %v282_v61 }
  0x30   :  { %385 = vmatpush.msra.mxu3 %v299_v62 }
  0x31   :  { %322 = vmatpush.msra.mxu2 %v281_v63 }
  0x32   :  { %386 = vmatpush.msra.mxu3 %v298_v0 }
  0x33   :  { %323 = vmatpush.msra.mxu2 %v280_v2 }
  0x34   :  { %387 = vmatpush.msra.mxu3 %v297_v3 }
  0x35   :  { %324 = vmatpush.msra.mxu2 %v279_v4 }
  0x36   :  { %133 = vmatmul.f32.gmra.mxu0 %v61_v34  ;;  %388 = vmatpush.msra.mxu3 %v296_v5 }
  0x37   :  { %198 = vmatmul.f32.gmra.mxu1 %v61_v34  ;;  %325 = vmatpush.msra.mxu2 %v278_v6 }
  0x38   :  { %389 = vmatpush.msra.mxu3 %v295_v7 }
  0x39   :  { %326 = vmatpush.msra.mxu2 %v277_v9 }
  0x3a   :  { %390 = vmatpush.msra.mxu3 %v294_v10 }
  0x3b   :  { %327 = vmatpush.msra.mxu2 %v276_v11 }
  0x3c   :  { %391 = vmatpush.msra.mxu3 %v293_v12 }
  0x3e   :  { %136 = vmatmul.f32.gmra.mxu0 %v62_v35  ;;  %392 = vmatpush.msra.mxu3 %v292_v13 }
  0x3f   :  { %201 = vmatmul.f32.gmra.mxu1 %v62_v35 }
  0x46   :  { %139 = vmatmul.f32.gmra.mxu0 %v63_v36 }
  0x47   :  { %204 = vmatmul.f32.gmra.mxu1 %v63_v36 }
  0x4e   :  { %142 = vmatmul.f32.gmra.mxu0 %v64_v37 }
  0x4f   :  { %207 = vmatmul.f32.gmra.mxu1 %v64_v37 }
  0x56   :  { %145 = vmatmul.f32.gmra.mxu0 %v65_v38 }
  0x57   :  { %210 = vmatmul.f32.gmra.mxu1 %v65_v38 }
  0x5e   :  { %148 = vmatmul.f32.gmra.mxu0 %v66_v39 }
  0x5f   :  { %213 = vmatmul.f32.gmra.mxu1 %v66_v39 }
  0x66   :  { %151 = vmatmul.f32.gmra.mxu0 %v67_v40 }
  0x67   :  { %216 = vmatmul.f32.gmra.mxu1 %v67_v40 }
  0x6e   :  { %154 = vmatmul.f32.gmra.mxu0 %v68_v41 }
  0x6f   :  { %219 = vmatmul.f32.gmra.mxu1 %v68_v41 }
  0x76   :  { %157 = vmatmul.f32.gmra.mxu0 %v69_v47 }
  0x77   :  { %222 = vmatmul.f32.gmra.mxu1 %v69_v47 }
  0x7e   :  { %160 = vmatmul.f32.gmra.mxu0 %v70_v56 }
  0x7f   :  { %225 = vmatmul.f32.gmra.mxu1 %v70_v56 }
  0x86   :  { %163 = vmatmul.f32.gmra.mxu0 %v71_v1 }
  0x87   :  { %228 = vmatmul.f32.gmra.mxu1 %v71_v1 }
  0x8e   :  { %166 = vmatmul.f32.gmra.mxu0 %v72_v8 }
  0x8f   :  { %231 = vmatmul.f32.gmra.mxu1 %v72_v8 }
  0x96   :  { %169 = vmatmul.f32.gmra.mxu0 %v73_v14 }
  0x97   :  { %234 = vmatmul.f32.gmra.mxu1 %v73_v14 }
  0x9e   :  { %172 = vmatmul.f32.gmra.mxu0 %v74_v15 }
  0x9f   :  { %237 = vmatmul.f32.gmra.mxu1 %v74_v15 }
  0xa6   :  { %175 = vmatmul.f32.gmra.mxu0 %v75_v16 }
  0xa7   :  { %240 = vmatmul.f32.gmra.mxu1 %v75_v16 }
  0xab   :  { %v131_v20 = vpop.f32.mrf.mxu0 }
  0xac   :  { %v196_v21 = vpop.f32.mrf.mxu1  ;;  %v132_v22 = vadd.f32 %v131_v20, %v720_v18 }
  0xad   :  { %v197_v23 = vadd.f32 %v196_v21, %v722_v19 }
  0xae   :  { %v244_v24 = vmax.f32 %v132_v22, 0.0 }
  0xaf   :  { %v245_v25 = vmax.f32 %v197_v23, 0.0 }
  0xb0   :  { %328 = vmatmul.f32.vlgmr.msra.gmra.mxu2 %v244_v24 }
  0xb1   :  { %393 = vmatmul.f32.vlgmr.msra.gmra.mxu3 %v245_v25 }
  0xb3   :  { %v134_v26 = vpop.f32.mrf.mxu0 }
  0xb4   :  { %v199_v27 = vpop.f32.mrf.mxu1  ;;  %v135_v28 = vadd.f32 %v134_v26, %v720_v18 }
  0xb5   :  { %v200_v29 = vadd.f32 %v199_v27, %v722_v19 }
  0xb6   :  { %v246_v30 = vmax.f32 %v135_v28, 0.0 }
  0xb7   :  { %v247_v31 = vmax.f32 %v200_v29, 0.0 }
  0xb8   :  { %331 = vmatmul.f32.gmra.mxu2 %v246_v30 }
  0xb9   :  { %396 = vmatmul.f32.gmra.mxu3 %v247_v31 }
  0xbb   :  { %v137_v32 = vpop.f32.mrf.mxu0 }
  0xbc   :  { %v202_v33 = vpop.f32.mrf.mxu1  ;;  %v138_v34 = vadd.f32 %v137_v32, %v720_v18 }
  0xbd   :  { %v203_v35 = vadd.f32 %v202_v33, %v722_v19 }
  0xbe   :  { %v248_v36 = vmax.f32 %v138_v34, 0.0 }
  0xbf   :  { %v249_v37 = vmax.f32 %v203_v35, 0.0 }
  0xc0   :  { %334 = vmatmul.f32.gmra.mxu2 %v248_v36 }
  0xc1   :  { %399 = vmatmul.f32.gmra.mxu3 %v249_v37 }
  0xc3   :  { %v140_v38 = vpop.f32.mrf.mxu0 }
  0xc4   :  { %v205_v39 = vpop.f32.mrf.mxu1  ;;  %v141_v40 = vadd.f32 %v140_v38, %v720_v18 }
  0xc5   :  { %v206_v41 = vadd.f32 %v205_v39, %v722_v19 }
  0xc6   :  { %v250_v42 = vmax.f32 %v141_v40, 0.0 }
  0xc7   :  { %v251_v43 = vmax.f32 %v206_v41, 0.0 }
  0xc8   :  { %337 = vmatmul.f32.gmra.mxu2 %v250_v42 }
  0xc9   :  { %402 = vmatmul.f32.gmra.mxu3 %v251_v43 }
  0xcb   :  { %v143_v44 = vpop.f32.mrf.mxu0 }
  0xcc   :  { %v208_v45 = vpop.f32.mrf.mxu1  ;;  %v144_v46 = vadd.f32 %v143_v44, %v720_v18 }
  0xcd   :  { %v209_v47 = vadd.f32 %v208_v45, %v722_v19 }
  0xce   :  { %v252_v48 = vmax.f32 %v144_v46, 0.0 }
  0xcf   :  { %v253_v49 = vmax.f32 %v209_v47, 0.0 }
  0xd0   :  { %340 = vmatmul.f32.gmra.mxu2 %v252_v48 }
  0xd1   :  { %405 = vmatmul.f32.gmra.mxu3 %v253_v49 }
  0xd3   :  { %v146_v50 = vpop.f32.mrf.mxu0 }
  0xd4   :  { %v211_v51 = vpop.f32.mrf.mxu1  ;;  %v147_v52 = vadd.f32 %v146_v50, %v720_v18 }
  0xd5   :  { %v212_v53 = vadd.f32 %v211_v51, %v722_v19 }
  0xd6   :  { %v254_v54 = vmax.f32 %v147_v52, 0.0 }
  0xd7   :  { %v255_v55 = vmax.f32 %v212_v53, 0.0 }
  0xd8   :  { %343 = vmatmul.f32.gmra.mxu2 %v254_v54  ;;  %v759_v54 = vld [vmem:[%s866_s4] ss:$0 sm:$0xff] }
  0xd9   :  { %408 = vmatmul.f32.gmra.mxu3 %v255_v55 }
  0xdb   :  { %v149_v56 = vpop.f32.mrf.mxu0 }
  0xdc   :  { %v214_v57 = vpop.f32.mrf.mxu1  ;;  %v150_v58 = vadd.f32 %v149_v56, %v720_v18 }
  0xdd   :  { %v215_v59 = vadd.f32 %v214_v57, %v722_v19 }
  0xde   :  { %v256_v60 = vmax.f32 %v150_v58, 0.0 }
  0xdf   :  { %v257_v61 = vmax.f32 %v215_v59, 0.0 }
  0xe0   :  { %346 = vmatmul.f32.gmra.mxu2 %v256_v60 }
  0xe1   :  { %411 = vmatmul.f32.gmra.mxu3 %v257_v61 }
  0xe3   :  { %v152_v62 = vpop.f32.mrf.mxu0 }
  0xe4   :  { %v217_v63 = vpop.f32.mrf.mxu1  ;;  %v153_v0 = vadd.f32 %v152_v62, %v720_v18 }
  0xe5   :  { %v218_v1 = vadd.f32 %v217_v63, %v722_v19 }
  0xe6   :  { %v258_v2 = vmax.f32 %v153_v0, 0.0 }
  0xe7   :  { %v259_v3 = vmax.f32 %v218_v1, 0.0 }
  0xe8   :  { %349 = vmatmul.f32.gmra.mxu2 %v258_v2 }
  0xe9   :  { %414 = vmatmul.f32.gmra.mxu3 %v259_v3 }
  0xeb   :  { %v155_v4 = vpop.f32.mrf.mxu0 }
  0xec   :  { %v220_v5 = vpop.f32.mrf.mxu1  ;;  %v156_v6 = vadd.f32 %v155_v4, %v720_v18 }
  0xed   :  { %v221_v7 = vadd.f32 %v220_v5, %v722_v19 }
  0xee   :  { %v260_v8 = vmax.f32 %v156_v6, 0.0 }
  0xef   :  { %v261_v9 = vmax.f32 %v221_v7, 0.0 }
  0xf0   :  { %352 = vmatmul.f32.gmra.mxu2 %v260_v8 }
  0xf1   :  { %417 = vmatmul.f32.gmra.mxu3 %v261_v9 }
  0xf3   :  { %v158_v10 = vpop.f32.mrf.mxu0 }
  0xf4   :  { %v223_v11 = vpop.f32.mrf.mxu1  ;;  %v159_v12 = vadd.f32 %v158_v10, %v720_v18 }
  0xf5   :  { %v224_v13 = vadd.f32 %v223_v11, %v722_v19 }
  0xf6   :  { %v262_v14 = vmax.f32 %v159_v12, 0.0 }
  0xf7   :  { %v263_v15 = vmax.f32 %v224_v13, 0.0 }
  0xf8   :  { %355 = vmatmul.f32.gmra.mxu2 %v262_v14 }
  0xf9   :  { %420 = vmatmul.f32.gmra.mxu3 %v263_v15 }
  0xfb   :  { %v161_v16 = vpop.f32.mrf.mxu0 }
  0xfc   :  { %v226_v17 = vpop.f32.mrf.mxu1  ;;  %v162_v20 = vadd.f32 %v161_v16, %v720_v18 }
  0xfd   :  { %v227_v21 = vadd.f32 %v226_v17, %v722_v19 }
  0xfe   :  { %v264_v22 = vmax.f32 %v162_v20, 0.0 }
  0xff   :  { %v265_v23 = vmax.f32 %v227_v21, 0.0 }
 0x100   :  { %358 = vmatmul.f32.gmra.mxu2 %v264_v22 }
 0x101   :  { %423 = vmatmul.f32.gmra.mxu3 %v265_v23 }
 0x103   :  { %v164_v24 = vpop.f32.mrf.mxu0 }
 0x104   :  { %v229_v25 = vpop.f32.mrf.mxu1  ;;  %v165_v26 = vadd.f32 %v164_v24, %v720_v18 }
 0x105   :  { %v230_v27 = vadd.f32 %v229_v25, %v722_v19 }
 0x106   :  { %v266_v28 = vmax.f32 %v165_v26, 0.0 }
 0x107   :  { %v267_v29 = vmax.f32 %v230_v27, 0.0 }
 0x108   :  { %361 = vmatmul.f32.gmra.mxu2 %v266_v28 }
 0x109   :  { %426 = vmatmul.f32.gmra.mxu3 %v267_v29 }
 0x10b   :  { %v167_v30 = vpop.f32.mrf.mxu0 }
 0x10c   :  { %v232_v31 = vpop.f32.mrf.mxu1  ;;  %v168_v32 = vadd.f32 %v167_v30, %v720_v18 }
 0x10d   :  { %v233_v33 = vadd.f32 %v232_v31, %v722_v19 }
 0x10e   :  { %v268_v34 = vmax.f32 %v168_v32, 0.0 }
 0x10f   :  { %v269_v35 = vmax.f32 %v233_v33, 0.0 }
 0x110   :  { %364 = vmatmul.f32.gmra.mxu2 %v268_v34 }
 0x111   :  { %429 = vmatmul.f32.gmra.mxu3 %v269_v35 }
 0x113   :  { %v170_v36 = vpop.f32.mrf.mxu0 }
 0x114   :  { %v235_v37 = vpop.f32.mrf.mxu1  ;;  %v171_v38 = vadd.f32 %v170_v36, %v720_v18 }
 0x115   :  { %v236_v39 = vadd.f32 %v235_v37, %v722_v19 }
 0x116   :  { %v270_v40 = vmax.f32 %v171_v38, 0.0 }
 0x117   :  { %v271_v41 = vmax.f32 %v236_v39, 0.0 }
 0x118   :  { %367 = vmatmul.f32.gmra.mxu2 %v270_v40 }
 0x119   :  { %432 = vmatmul.f32.gmra.mxu3 %v271_v41 }
 0x11b   :  { %v173_v42 = vpop.f32.mrf.mxu0 }
 0x11c   :  { %v238_v43 = vpop.f32.mrf.mxu1  ;;  %v174_v44 = vadd.f32 %v173_v42, %v720_v18 }
 0x11d   :  { %v239_v45 = vadd.f32 %v238_v43, %v722_v19 }
 0x11e   :  { %v272_v46 = vmax.f32 %v174_v44, 0.0 }
 0x11f   :  { %v273_v47 = vmax.f32 %v239_v45, 0.0 }
 0x120   :  { %370 = vmatmul.f32.gmra.mxu2 %v272_v46 }
 0x121   :  { %435 = vmatmul.f32.gmra.mxu3 %v273_v47 }
 0x123   :  { %v176_v48 = vpop.f32.mrf.mxu0 }
 0x124   :  { %v241_v49 = vpop.f32.mrf.mxu1  ;;  %v177_v50 = vadd.f32 %v176_v48, %v720_v18  ;;  %v765_v18 = vld [vmem:[%s867_s5] ss:$0 sm:$0xff] }
 0x125   :  { %v242_v51 = vadd.f32 %v241_v49, %v722_v19 }
 0x126   :  { %v274_v52 = vmax.f32 %v177_v50, 0.0 }
 0x127   :  { %v275_v53 = vmax.f32 %v242_v51, 0.0 }
 0x128   :  { %373 = vmatmul.f32.gmra.mxu2 %v274_v52 }
 0x129   :  { %438 = vmatmul.f32.gmra.mxu3 %v275_v53 }
 0x133   :  { %v329_v55 = vpop.f32.mrf.mxu2 }
 0x134   :  { %v394_v56 = vpop.f32.mrf.mxu3  ;;  %v330_v57 = vadd.f32 %v759_v54, %v329_v55 }
 0x136   :  { %v395_v58 = vadd.f32 %v394_v56, %v330_v57 }
 0x138   :  { %v442_v19 = vmax.f32 %v395_v58, 0.0 }
 0x13a   :  { %v462_v59 = vmul.f32 %v765_v18, %v442_v19 }
 0x13b   :  { %v332_v60 = vpop.f32.mrf.mxu2 }
 0x13c   :  { %v397_v61 = vpop.f32.mrf.mxu3  ;;  %v333_v62 = vadd.f32 %v759_v54, %v332_v60  ;;  %478 = vadd.xlane.f32.xlu0 %v462_v59 }
 0x13e   :  { %v398_v63 = vadd.f32 %v397_v61, %v333_v62 }
 0x140   :  { %v443_v0 = vmax.f32 %v398_v63, 0.0 }
 0x142   :  { %v463_v1 = vmul.f32 %v765_v18, %v443_v0 }
 0x143   :  { %v335_v2 = vpop.f32.mrf.mxu2 }
 0x144   :  { %v400_v3 = vpop.f32.mrf.mxu3  ;;  %v336_v4 = vadd.f32 %v759_v54, %v335_v2  ;;  %480 = vadd.xlane.f32.xlu0 %v463_v1 }
 0x146   :  { %v401_v5 = vadd.f32 %v400_v3, %v336_v4 }
 0x148   :  { %v444_v6 = vmax.f32 %v401_v5, 0.0 }
 0x14a   :  { %v464_v7 = vmul.f32 %v765_v18, %v444_v6 }
 0x14b   :  { %v338_v8 = vpop.f32.mrf.mxu2 }
 0x14c   :  { %v403_v9 = vpop.f32.mrf.mxu3  ;;  %v339_v10 = vadd.f32 %v759_v54, %v338_v8  ;;  %482 = vadd.xlane.f32.xlu1 %v464_v7 }
 0x14e   :  { %v404_v11 = vadd.f32 %v403_v9, %v339_v10 }
 0x150   :  { %v445_v12 = vmax.f32 %v404_v11, 0.0 }
 0x152   :  { %v465_v13 = vmul.f32 %v765_v18, %v445_v12 }
 0x153   :  { %v341_v14 = vpop.f32.mrf.mxu2 }
 0x154   :  { %v406_v15 = vpop.f32.mrf.mxu3  ;;  %v342_v16 = vadd.f32 %v759_v54, %v341_v14  ;;  %484 = vadd.xlane.f32.xlu1 %v465_v13 }
 0x156   :  { %v407_v17 = vadd.f32 %v406_v15, %v342_v16 }
 0x158   :  { %v446_v20 = vmax.f32 %v407_v17, 0.0 }
 0x15a   :  { %v466_v21 = vmul.f32 %v765_v18, %v446_v20 }
 0x15b   :  { %v344_v22 = vpop.f32.mrf.mxu2 }
 0x15c   :  { %v409_v23 = vpop.f32.mrf.mxu3  ;;  %v345_v24 = vadd.f32 %v759_v54, %v344_v22  ;;  %486 = vadd.xlane.f32.xlu2 %v466_v21 }
 0x15e   :  { %v410_v25 = vadd.f32 %v409_v23, %v345_v24  ;;  %v561_v23 = vld [vmem:[#allocation2] ss:$0 sm:$0xff] }
 0x160   :  { %v447_v26 = vmax.f32 %v410_v25, 0.0 }
 0x162   :  { %v467_v27 = vmul.f32 %v765_v18, %v447_v26 }
 0x163   :  { %v347_v28 = vpop.f32.mrf.mxu2 }
 0x164   :  { %v412_v29 = vpop.f32.mrf.mxu3  ;;  %v348_v30 = vadd.f32 %v759_v54, %v347_v28  ;;  %488 = vadd.xlane.f32.xlu2 %v467_v27 }
 0x166   :  { %v413_v31 = vadd.f32 %v412_v29, %v348_v30 }
 0x168   :  { %v448_v32 = vmax.f32 %v413_v31, 0.0 }
 0x16a   :  { %v468_v33 = vmul.f32 %v765_v18, %v448_v32 }
 0x16b   :  { %v350_v34 = vpop.f32.mrf.mxu2 }
 0x16c   :  { %v415_v35 = vpop.f32.mrf.mxu3  ;;  %v351_v36 = vadd.f32 %v759_v54, %v350_v34  ;;  %490 = vadd.xlane.f32.xlu0 %v468_v33 }
 0x16e   :  { %v416_v37 = vadd.f32 %v415_v35, %v351_v36 }
 0x170   :  { %v449_v38 = vmax.f32 %v416_v37, 0.0 }
 0x172   :  { %v469_v39 = vmul.f32 %v765_v18, %v449_v38 }
 0x173   :  { %v353_v40 = vpop.f32.mrf.mxu2 }
 0x174   :  { %v418_v41 = vpop.f32.mrf.mxu3  ;;  %v354_v42 = vadd.f32 %v759_v54, %v353_v40  ;;  %492 = vadd.xlane.f32.xlu1 %v469_v39 }
 0x176   :  { %v419_v43 = vadd.f32 %v418_v41, %v354_v42 }
 0x178   :  { %v450_v44 = vmax.f32 %v419_v43, 0.0 }
 0x17a   :  { %v470_v45 = vmul.f32 %v765_v18, %v450_v44 }
 0x17b   :  { %v356_v46 = vpop.f32.mrf.mxu2 }
 0x17c   :  { %v421_v47 = vpop.f32.mrf.mxu3  ;;  %v357_v48 = vadd.f32 %v759_v54, %v356_v46  ;;  %494 = vadd.xlane.f32.xlu2 %v470_v45 }
 0x17e   :  { %v422_v49 = vadd.f32 %v421_v47, %v357_v48 }
 0x180   :  { %v451_v50 = vmax.f32 %v422_v49, 0.0 }
 0x182   :  { %v471_v51 = vmul.f32 %v765_v18, %v451_v50 }
 0x183   :  { %v359_v52 = vpop.f32.mrf.mxu2 }
 0x184   :  { %v424_v53 = vpop.f32.mrf.mxu3  ;;  %v360_v55 = vadd.f32 %v759_v54, %v359_v52  ;;  %496 = vadd.xlane.f32.xlu0 %v471_v51 }
 0x186   :  { %v425_v56 = vadd.f32 %v424_v53, %v360_v55 }
 0x188   :  { %v452_v57 = vmax.f32 %v425_v56, 0.0 }
 0x18a   :  { %v472_v58 = vmul.f32 %v765_v18, %v452_v57 }
 0x18b   :  { %v362_v19 = vpop.f32.mrf.mxu2 }
 0x18c   :  { %v427_v59 = vpop.f32.mrf.mxu3  ;;  %v363_v60 = vadd.f32 %v759_v54, %v362_v19  ;;  %498 = vadd.xlane.f32.xlu1 %v472_v58 }
 0x18e   :  { %v428_v61 = vadd.f32 %v427_v59, %v363_v60 }
 0x190   :  { %v453_v62 = vmax.f32 %v428_v61, 0.0 }
 0x192   :  { %v473_v63 = vmul.f32 %v765_v18, %v453_v62 }
 0x193   :  { %v365_v0 = vpop.f32.mrf.mxu2 }
 0x194   :  { %v430_v1 = vpop.f32.mrf.mxu3  ;;  %v366_v2 = vadd.f32 %v759_v54, %v365_v0  ;;  %500 = vadd.xlane.f32.xlu2 %v473_v63 }
 0x196   :  { %v431_v3 = vadd.f32 %v430_v1, %v366_v2 }
 0x198   :  { %v454_v4 = vmax.f32 %v431_v3, 0.0 }
 0x19a   :  { %v474_v5 = vmul.f32 %v765_v18, %v454_v4 }
 0x19b   :  { %v368_v6 = vpop.f32.mrf.mxu2 }
 0x19c   :  { %v433_v7 = vpop.f32.mrf.mxu3  ;;  %v369_v8 = vadd.f32 %v759_v54, %v368_v6  ;;  %502 = vadd.xlane.f32.xlu0 %v474_v5 }
 0x19e   :  { %v434_v9 = vadd.f32 %v433_v7, %v369_v8 }
 0x1a0   :  { %v455_v10 = vmax.f32 %v434_v9, 0.0 }
 0x1a2   :  { %v475_v11 = vmul.f32 %v765_v18, %v455_v10 }
 0x1a3   :  { %v371_v12 = vpop.f32.mrf.mxu2 }
 0x1a4   :  { %v436_v13 = vpop.f32.mrf.mxu3  ;;  %v372_v14 = vadd.f32 %v759_v54, %v371_v12  ;;  %504 = vadd.xlane.f32.xlu1 %v475_v11 }
 0x1a6   :  { %v437_v15 = vadd.f32 %v436_v13, %v372_v14 }
 0x1a8   :  { %v456_v16 = vmax.f32 %v437_v15, 0.0 }
 0x1aa   :  { %v476_v17 = vmul.f32 %v765_v18, %v456_v16 }
 0x1ab   :  { %v374_v20 = vpop.f32.mrf.mxu2 }
 0x1ac   :  { %v439_v21 = vpop.f32.mrf.mxu3  ;;  %v375_v22 = vadd.f32 %v759_v54, %v374_v20  ;;  %506 = vadd.xlane.f32.xlu2 %v476_v17 }
 0x1ae   :  { %v440_v24 = vadd.f32 %v439_v21, %v375_v22 }
 0x1af   :  { %v479_v25 = vpop.xlane.xlu0 %478 }
 0x1b0   :  { %v457_v26 = vmax.f32 %v440_v24, 0.0  ;;  %v514_v27 = vadd.f32 %v561_v23, %v479_v25 }
 0x1b2   :  { %531 = vst.msk [vmem:[%s869_s7] sm:$0xff] %vm530_vm0, %v514_v27  ;;  %v477_v28 = vmul.f32 %v765_v18, %v457_v26 }
 0x1b4   :  { %508 = vadd.xlane.f32.xlu0 %v477_v28 }
 0x1b7   :  { %v481_v29 = vpop.xlane.xlu0 %480 }
 0x1b8   :  { %v515_v30 = vadd.f32 %v561_v23, %v481_v29 }
 0x1ba   :  { %532 = vst.msk [vmem:[%s869_s7 + $0x8] sm:$0xff] %vm530_vm0, %v515_v30 }
 0x1bf   :  { %v483_v54 = vpop.xlane.xlu1 %482 }
 0x1c0   :  { %v516_v31 = vadd.f32 %v561_v23, %v483_v54 }
 0x1c2   :  { %533 = vst.msk [vmem:[%s869_s7 + $0x10] sm:$0xff] %vm530_vm0, %v516_v31 }
 0x1c7   :  { %v485_v32 = vpop.xlane.xlu1 %484 }
 0x1c8   :  { %v517_v33 = vadd.f32 %v561_v23, %v485_v32 }
 0x1ca   :  { %534 = vst.msk [vmem:[%s869_s7 + $0x18] sm:$0xff] %vm530_vm0, %v517_v33 }
 0x1cf   :  { %v487_v18 = vpop.xlane.xlu2 %486 }
 0x1d0   :  { %v518_v34 = vadd.f32 %v561_v23, %v487_v18 }
 0x1d2   :  { %535 = vst.msk [vmem:[%s869_s7 + $0x20] sm:$0xff] %vm530_vm0, %v518_v34 }
 0x1d7   :  { %v489_v35 = vpop.xlane.xlu2 %488 }
 0x1d8   :  { %v519_v36 = vadd.f32 %v561_v23, %v489_v35 }
 0x1da   :  { %536 = vst.msk [vmem:[%s869_s7 + $0x28] sm:$0xff] %vm530_vm0, %v519_v36 }
 0x1df   :  { %v491_v37 = vpop.xlane.xlu0 %490 }
 0x1e0   :  { %v520_v38 = vadd.f32 %v561_v23, %v491_v37 }
 0x1e2   :  { %537 = vst.msk [vmem:[%s869_s7 + $0x30] sm:$0xff] %vm530_vm0, %v520_v38 }
 0x1e7   :  { %v493_v39 = vpop.xlane.xlu1 %492 }
 0x1e8   :  { %v521_v40 = vadd.f32 %v561_v23, %v493_v39 }
 0x1ea   :  { %538 = vst.msk [vmem:[%s869_s7 + $0x38] sm:$0xff] %vm530_vm0, %v521_v40 }
 0x1ef   :  { %v495_v41 = vpop.xlane.xlu2 %494 }
 0x1f0   :  { %v522_v42 = vadd.f32 %v561_v23, %v495_v41 }
 0x1f2   :  { %539 = vst.msk [vmem:[%s869_s7 + $0x40] sm:$0xff] %vm530_vm0, %v522_v42 }
 0x1f7   :  { %v497_v43 = vpop.xlane.xlu0 %496 }
 0x1f8   :  { %v523_v44 = vadd.f32 %v561_v23, %v497_v43 }
 0x1fa   :  { %540 = vst.msk [vmem:[%s869_s7 + $0x48] sm:$0xff] %vm530_vm0, %v523_v44 }
 0x1ff   :  { %v499_v45 = vpop.xlane.xlu1 %498 }
 0x200   :  { %v524_v46 = vadd.f32 %v561_v23, %v499_v45 }
 0x202   :  { %541 = vst.msk [vmem:[%s869_s7 + $0x50] sm:$0xff] %vm530_vm0, %v524_v46 }
 0x207   :  { %v501_v47 = vpop.xlane.xlu2 %500 }
 0x208   :  { %v525_v48 = vadd.f32 %v561_v23, %v501_v47 }
 0x20a   :  { %542 = vst.msk [vmem:[%s869_s7 + $0x58] sm:$0xff] %vm530_vm0, %v525_v48 }
 0x20f   :  { %v503_v49 = vpop.xlane.xlu0 %502 }
 0x210   :  { %v526_v50 = vadd.f32 %v561_v23, %v503_v49 }
 0x212   :  { %543 = vst.msk [vmem:[%s869_s7 + $0x60] sm:$0xff] %vm530_vm0, %v526_v50 }
 0x217   :  { %v505_v51 = vpop.xlane.xlu1 %504 }
 0x218   :  { %v527_v52 = vadd.f32 %v561_v23, %v505_v51 }
 0x21a   :  { %544 = vst.msk [vmem:[%s869_s7 + $0x68] sm:$0xff] %vm530_vm0, %v527_v52 }
 0x21f   :  { %v507_v53 = vpop.xlane.xlu2 %506 }
 0x220   :  { %v528_v55 = vadd.f32 %v561_v23, %v507_v53 }
 0x222   :  { %545 = vst.msk [vmem:[%s869_s7 + $0x70] sm:$0xff] %vm530_vm0, %v528_v55 }
 0x227   :  { %v509_v56 = vpop.xlane.xlu0 %508 }
 0x228   :  { %v529_v57 = vadd.f32 %v561_v23, %v509_v56 }
 0x22a   :  { %546 = vst.msk [vmem:[%s869_s7 + $0x78] sm:$0xff] %vm530_vm0, %v529_v57 }
 0x22b   :  { %551 = vsyncpa [#allocation4], 1 }
 0x22c   :  { %552 = vsyncpa [#allocation6], 1 }

</bundles_post_ra>
